<compile_context>
chip_gen: v7x
topology: tpu7x:2x2x1
jax: 0.10.0
libtpu: 0.0.40
codegen_flags: <defaults>
</compile_context>

<pallas_src>
import jax
import jax.numpy as jnp
from jax.experimental import pallas as pl
from jax.experimental.pallas import tpu as pltpu


# ---------------------------------------------------------------------------
# Tile-size selection
# ---------------------------------------------------------------------------
# Conservative per-kernel VMEM budget.  With BlockSpec double-buffering the
# input and output each hold 2 buffers of (N, TC) -> ~4 * N * TC * itemsize B.
# 8 MiB fits the *default* scoped VMEM on every generation (v5e 16 MiB,
# v6e 32 MiB, v7x 32 MiB), so no vmem_limit_bytes override is needed.
_VMEM_BUDGET_BYTES = 8 * 1024 * 1024


def _pick_lane_tile(n, c, itemsize):
    """Lane-dense channel tile: a multiple of 128 lanes, or the full last dim
    when it is small / not 128-aligned (full-dim blocks satisfy the (8,128)
    rule)."""
    if c <= 128 or c % 128 != 0:
        return int(c)
    bytes_per_lane = 4 * n * max(int(itemsize), 1)  # 2 in-bufs + 2 out-bufs
    tc = (_VMEM_BUDGET_BYTES // max(bytes_per_lane, 1)) // 128 * 128
    return int(min(max(tc, 128), c))


# ---------------------------------------------------------------------------
# Pallas kernel: straight lane-dense copy
# ---------------------------------------------------------------------------
def _copy_kernel(x_ref, o_ref):
    o_ref[...] = x_ref[...]


def identity_copy_pallas(x):
    """Tiled, pipelined HBM->HBM copy of x.  `Nothing.forward` itself needs no
    kernel (see NothingPallas); this exists only if a materialized copy is
    required."""
    orig_shape = x.shape
    if x.ndim == 0:
        x2 = x.reshape(1, 1)
    elif x.ndim == 1:
        x2 = x.reshape(1, -1)
    else:
        x2 = x.reshape(-1, x.shape[-1])
    n, c = x2.shape
    tc = _pick_lane_tile(n, c, x2.dtype.itemsize)
    out = pl.pallas_call(
        _copy_kernel,
        out_shape=jax.ShapeDtypeStruct((n, c), x2.dtype),
        grid=(pl.cdiv(c, tc),),
        in_specs=[pl.BlockSpec((n, tc), lambda j: (0, j))],
        out_specs=pl.BlockSpec((n, tc), lambda j: (0, j)),
        compiler_params=pltpu.CompilerParams(dimension_semantics=("parallel",)),
    )(x2)
    return out.reshape(orig_shape)


class NothingPallas:
    """JAX equivalent of the PyTorch `Nothing` module: forward(x) = x.
    The identity is elided entirely (no kernel launch, no HBM traffic)."""

    def __call__(self, x):
        return x


if __name__ == "__main__":
    key = jax.random.PRNGKey(0)
    x = jax.random.normal(key, (2, 4, 16, 16), dtype=jnp.float32)

    # --- The spec module: Nothing (identity). No kernel launch needed. ---
    nothing = NothingPallas()
    y = nothing(x)
    jax.block_until_ready(y)
    assert y.shape == x.shape and bool(jnp.array_equal(y, x))

    # --- Pallas copy kernel (only if a materialized copy is ever needed). ---
    y_copy = identity_copy_pallas(x)
    jax.block_until_ready(y_copy)
    assert y_copy.shape == x.shape and bool(jnp.array_equal(y_copy, x))

    # Also exercise a lane-dense shape that is a multiple of 128.
    x2 = jax.random.normal(key, (8, 256), dtype=jnp.float32)
    y2 = identity_copy_pallas(x2)
    jax.block_until_ready(y2)
    assert bool(jnp.array_equal(y2, x2))

    print("KERNEL_OK")
</pallas_src>

<mosaic_0001>
module attributes {stable_mosaic.version = 11 : i64} {
  func.func @_copy_kernel(%arg0: i32, %arg1: memref<128x16xf32, #tpu.memory_space<vmem>>, %arg2: memref<128x16xf32, #tpu.memory_space<vmem>>) attributes {dimension_semantics = [#tpu.dimension_semantics<parallel>], iteration_bounds = array<i64: 1>, scalar_prefetch = 0 : i64, scratch_operands = 0 : i64, tpu.core_type = #tpu.core_type<tc>, window_params = [{transform_indices = @transform_0, window_bounds = array<i64: 128, 16>}, {transform_indices = @transform_1, window_bounds = array<i64: 128, 16>}]} {
    %c0 = arith.constant 0 : index
    %c0_0 = arith.constant 0 : index
    %0 = vector.load %arg1[%c0, %c0_0] : memref<128x16xf32, #tpu.memory_space<vmem>>, vector<128x16xf32>
    %c0_1 = arith.constant 0 : index
    %c0_2 = arith.constant 0 : index
    %1 = vector.load %arg2[%c0_1, %c0_2] : memref<128x16xf32, #tpu.memory_space<vmem>>, vector<128x16xf32>
    tpu.vector_store %arg2[%c0_1, %c0_2], %0 {strides = array<i32>} : memref<128x16xf32, #tpu.memory_space<vmem>>, vector<128x16xf32>,
    return
  }
  func.func @transform_0(%arg0: i32) -> (i32, i32) {
    %c0_i32 = arith.constant 0 : i32
    %c0_i32_0 = arith.constant 0 : i32
    return %c0_i32, %arg0 : i32, i32
  }
  func.func @transform_1(%arg0: i32) -> (i32, i32) {
    %c0_i32 = arith.constant 0 : i32
    %c0_i32_0 = arith.constant 0 : i32
    return %c0_i32, %arg0 : i32, i32
  }
}

</mosaic_0001>

<bundles_post_ra>
// kernel: tpu_custom_call.1
= control target key start
LH: loop header
LB: loop body
LE: loop exit
PB: predicated region body
PF: predicated region fallthrough
CT: control target
= control target key end

     0   :  { %vm24_vm0 = vcmask 130048   ;;  %s167_s0 = inlined_call_operand.vmem [shape: f32[128,16], index: 0, kind: input, shape index: {}]   ;;  %s168_s1 = inlined_call_operand.vmem [shape: f32[128,16], index: 1, kind: output, shape index: {}]  }
   0x1   :  { %v8_v0 = vld [vmem:[%s167_s0] sm:$0xff]  ;;  %v9_v1 = vld [vmem:[%s167_s0 + $0x8] sm:$0xff]  ;;  %v10_v2 = vld [vmem:[%s167_s0 + $0x10] sm:$0xff] }
   0x2   :  { %25 = vst.msk [vmem:[%s168_s1] sm:$0xff] %vm24_vm0, %v8_v0  ;;  %26 = vst.msk [vmem:[%s168_s1 + $0x8] sm:$0xff] %vm24_vm0, %v9_v1  ;;  %v11_v3 = vld [vmem:[%s167_s0 + $0x18] sm:$0xff]  ;;  %v12_v4 = vld [vmem:[%s167_s0 + $0x20] sm:$0xff] }
   0x3   :  { %27 = vst.msk [vmem:[%s168_s1 + $0x10] sm:$0xff] %vm24_vm0, %v10_v2  ;;  %v13_v5 = vld [vmem:[%s167_s0 + $0x28] sm:$0xff]  ;;  %28 = vst.msk [vmem:[%s168_s1 + $0x18] sm:$0xff] %vm24_vm0, %v11_v3  ;;  %v14_v6 = vld [vmem:[%s167_s0 + $0x30] sm:$0xff] }
   0x4   :  { %29 = vst.msk [vmem:[%s168_s1 + $0x20] sm:$0xff] %vm24_vm0, %v12_v4  ;;  %30 = vst.msk [vmem:[%s168_s1 + $0x28] sm:$0xff] %vm24_vm0, %v13_v5  ;;  %v15_v7 = vld [vmem:[%s167_s0 + $0x38] sm:$0xff]  ;;  %v16_v8 = vld [vmem:[%s167_s0 + $0x40] sm:$0xff] }
   0x5   :  { %31 = vst.msk [vmem:[%s168_s1 + $0x30] sm:$0xff] %vm24_vm0, %v14_v6  ;;  %32 = vst.msk [vmem:[%s168_s1 + $0x38] sm:$0xff] %vm24_vm0, %v15_v7  ;;  %v17_v9 = vld [vmem:[%s167_s0 + $0x48] sm:$0xff]  ;;  %v18_v10 = vld [vmem:[%s167_s0 + $0x50] sm:$0xff] }
   0x6   :  { %33 = vst.msk [vmem:[%s168_s1 + $0x40] sm:$0xff] %vm24_vm0, %v16_v8  ;;  %v19_v11 = vld [vmem:[%s167_s0 + $0x58] sm:$0xff]  ;;  %34 = vst.msk [vmem:[%s168_s1 + $0x48] sm:$0xff] %vm24_vm0, %v17_v9  ;;  %v20_v12 = vld [vmem:[%s167_s0 + $0x60] sm:$0xff] }
   0x7   :  { %35 = vst.msk [vmem:[%s168_s1 + $0x50] sm:$0xff] %vm24_vm0, %v18_v10  ;;  %36 = vst.msk [vmem:[%s168_s1 + $0x58] sm:$0xff] %vm24_vm0, %v19_v11  ;;  %v21_v13 = vld [vmem:[%s167_s0 + $0x68] sm:$0xff]  ;;  %v22_v14 = vld [vmem:[%s167_s0 + $0x70] sm:$0xff] }
   0x8   :  { %37 = vst.msk [vmem:[%s168_s1 + $0x60] sm:$0xff] %vm24_vm0, %v20_v12  ;;  %38 = vst.msk [vmem:[%s168_s1 + $0x68] sm:$0xff] %vm24_vm0, %v21_v13  ;;  %v23_v15 = vld [vmem:[%s167_s0 + $0x78] sm:$0xff] }
   0x9   :  { %39 = vst.msk [vmem:[%s168_s1 + $0x70] sm:$0xff] %vm24_vm0, %v22_v14  ;;  %40 = vst.msk [vmem:[%s168_s1 + $0x78] sm:$0xff] %vm24_vm0, %v23_v15 }

</bundles_post_ra>
